<compile_context>
chip_gen: v7x
topology: tpu7x:2x2x1
jax: 0.10.0
libtpu: 0.0.40
codegen_flags: <defaults>
</compile_context>

<pallas_src>
import math
import functools

import jax
import jax.numpy as jnp
from jax.experimental import pallas as pl
from jax.experimental.pallas import tpu as pltpu


# ----------------------------------------------------------------------------
# Kernel: fused L-layer GCNII stack, everything VMEM-resident, no grid.
# ----------------------------------------------------------------------------
def _gcnii_stack_kernel(x_ref, h0_ref, lap_ref, w_ref, out_ref, *,
                        num_layers, alpha, residual, matmul_dtype):
    """x_ref, h0_ref : (N, B*F)   lane-packed batch
       lap_ref       : (N, N)     (1-alpha) already folded in
       w_ref         : (L, B*F, B*D)  theta-folded, block-diagonal per layer
       out_ref       : (N, B*D)
    """
    lap = lap_ref[...]
    if matmul_dtype is not None:
        lap = lap.astype(matmul_dtype)

    # f32 carry / f32 epilogue math regardless of the matmul operand dtype.
    x = x_ref[...].astype(jnp.float32)
    alpha_h0 = alpha * h0_ref[...].astype(jnp.float32)   # hoisted out of the loop

    # Static unroll over the (small) layer stack: 2 MXU pushes per layer.
    for layer in range(num_layers):
        w = w_ref[layer]
        if matmul_dtype is not None:
            w = w.astype(matmul_dtype)

        hi = jnp.dot(lap, x.astype(lap.dtype),
                     preferred_element_type=jnp.float32)          # (N, B*F)
        support = hi + alpha_h0                                    # f32 VPU
        out = jnp.dot(support.astype(w.dtype), w,
                      preferred_element_type=jnp.float32)          # (N, B*D)
        if residual:
            out = out + x
        x = out                                                    # carry

    out_ref[...] = x.astype(out_ref.dtype)


# ----------------------------------------------------------------------------
# Parameter-setup-time folds (do ONCE when parameters are created, then cache).
# ----------------------------------------------------------------------------
def gcnii_theta(lmd, l):
    return math.log(lmd / l + 1.0)


def prepare_gcnii_params(weights, laplacian, *, lmd, alpha, layer_indices,
                         batch, param_dtype=jnp.float32):
    """Returns (lap_folded, w_stack) ready for the fused kernel.

      lap_folded = (1 - alpha) * laplacian                       (N, N)
      W'_l       = (1 - theta_l) I + theta_l W_l                 theta fold
      w_stack    = stack_l kron(I_B, W'_l)                       (L, B*F, B*D)

    Use param_dtype=jnp.bfloat16 for bf16-at-rest parameters (native MXU path,
    half the DMA bytes); keep f32 for tight numerics.
    """
    lap_folded = ((1.0 - alpha) * laplacian.astype(jnp.float32)).astype(param_dtype)

    eye_b = jnp.eye(batch, dtype=jnp.float32)
    blocks = []
    for w, l in zip(weights, layer_indices):
        f, d = w.shape
        assert f == d, "variant=False GCNII requires in_dim == dim"
        theta = gcnii_theta(lmd, l)
        w_fold = ((1.0 - theta) * jnp.eye(f, dtype=jnp.float32)
                  + theta * w.astype(jnp.float32))
        blocks.append(jnp.kron(eye_b, w_fold))                    # (B*F, B*D)
    w_stack = jnp.stack(blocks, axis=0).astype(param_dtype)       # (L, B*F, B*D)
    return lap_folded, w_stack


# ----------------------------------------------------------------------------
# Wrapper
# ----------------------------------------------------------------------------
def gcnii_stack_forward(x, h0, lap_folded, w_stack, *, alpha, residual=False,
                        matmul_dtype=None):
    """Fused forward through L stacked GraphConvolutionII layers.

    x, h0      : (B, N, F)
    lap_folded : (N, N)          from prepare_gcnii_params
    w_stack    : (L, B*F, B*D)   from prepare_gcnii_params
    Returns (B, N, D).
    """
    B, N, F = x.shape
    assert h0.shape == (B, N, F)
    L, BF, BD = w_stack.shape
    assert BF == B * F
    D = BD // B
    assert B * D == BD and F == D, "layer carry requires in_dim == dim"
    assert lap_folded.shape == (N, N)

    # Lane-pack the batch: (B, N, F) -> (N, B*F).  Cheap host-side layout op.
    xp = jnp.transpose(x, (1, 0, 2)).reshape(N, B * F)
    h0p = jnp.transpose(h0, (1, 0, 2)).reshape(N, B * F)

    kernel = functools.partial(
        _gcnii_stack_kernel,
        num_layers=int(L),
        alpha=float(alpha),
        residual=bool(residual),
        matmul_dtype=matmul_dtype,
    )

    itemsize = lambda a: jnp.dtype(a.dtype).itemsize
    cost = pl.CostEstimate(
        flops=L * (2 * N * N * (B * F) + 2 * N * (B * F) * (B * D)),
        transcendentals=0,
        bytes_accessed=(xp.size * itemsize(xp) + h0p.size * itemsize(h0p)
                        + lap_folded.size * itemsize(lap_folded)
                        + w_stack.size * itemsize(w_stack)
                        + N * B * D * itemsize(x)),
    )

    vmem = pltpu.MemorySpace.VMEM
    outp = pl.pallas_call(
        kernel,
        out_shape=jax.ShapeDtypeStruct((N, B * D), x.dtype),
        in_specs=[
            pl.BlockSpec(memory_space=vmem),   # x packed     (N, B*F)
            pl.BlockSpec(memory_space=vmem),   # h0 packed    (N, B*F)
            pl.BlockSpec(memory_space=vmem),   # laplacian'   (N, N)
            pl.BlockSpec(memory_space=vmem),   # weight stack (L, B*F, B*D)
        ],
        out_specs=pl.BlockSpec(memory_space=vmem),
        cost_estimate=cost,
    )(xp, h0p, lap_folded, w_stack)

    # Unpack lanes: (N, B*D) -> (B, N, D).
    return jnp.transpose(outp.reshape(N, B, D), (1, 0, 2))


# ----------------------------------------------------------------------------
# Deterministic synthetic laplacian buffer (normalized adjacency of an 8x8
# board; nodes within Chebyshev distance <= radius are connected).
# ----------------------------------------------------------------------------
def get_laplacian_matrix(radius, board_size=8):
    n = board_size * board_size
    coords = jnp.stack(
        jnp.meshgrid(jnp.arange(board_size), jnp.arange(board_size),
                     indexing="ij"),
        axis=-1,
    ).reshape(n, 2).astype(jnp.float32)
    diff = jnp.abs(coords[:, None, :] - coords[None, :, :])
    cheb = jnp.max(diff, axis=-1)
    adj = (cheb <= radius).astype(jnp.float32)   # includes self-loops
    deg = jnp.sum(adj, axis=-1)
    d_inv_sqrt = 1.0 / jnp.sqrt(deg)
    return adj * d_inv_sqrt[:, None] * d_inv_sqrt[None, :]


# ----------------------------------------------------------------------------
# Pure-JAX reference (mirrors the PyTorch module, layer by layer).
# ----------------------------------------------------------------------------
def reference_stack(x, h0, laplacian, weights, *, lmd, alpha, layer_indices,
                    residual=False):
    out = x
    for w, l in zip(weights, layer_indices):
        theta = math.log(lmd / l + 1.0)
        hi = jnp.einsum("nm,bmf->bnf", laplacian, out)
        support = (1.0 - alpha) * hi + alpha * h0
        new = (1.0 - theta) * support + theta * jnp.einsum("bnf,fd->bnd",
                                                           support, w)
        if residual:
            new = new + out
        out = new
    return out


if __name__ == "__main__":
    key = jax.random.PRNGKey(0)

    # Small shapes consistent with the module: B=2 graphs, N=64 nodes (8x8
    # board), in_dim=dim=32, a 4-layer GCNII stack (layer indices 1..4).
    B, N, F, D = 2, 64, 32, 32
    radius = 6
    num_layers = 4
    lmd, alpha = 0.5, 0.1
    layer_indices = list(range(1, num_layers + 1))

    keys = jax.random.split(key, 2 + num_layers)
    x = jax.random.normal(keys[0], (B, N, F), dtype=jnp.float32)
    h0 = jax.random.normal(keys[1], (B, N, F), dtype=jnp.float32)

    stdv = 1.0 / math.sqrt(D)   # matches reset_parameters
    weights = [
        jax.random.uniform(keys[2 + i], (F, D), minval=-stdv, maxval=stdv,
                           dtype=jnp.float32)
        for i in range(num_layers)
    ]
    laplacian = get_laplacian_matrix(radius, board_size=8)

    # --- main path: fused 4-layer stack, f32 parameters -----------------------
    lap_f32, w_f32 = prepare_gcnii_params(
        weights, laplacian, lmd=lmd, alpha=alpha,
        layer_indices=layer_indices, batch=B)
    out = gcnii_stack_forward(x, h0, lap_f32, w_f32, alpha=alpha,
                              residual=False)
    out = jax.block_until_ready(out)
    ref = reference_stack(x, h0, laplacian, weights, lmd=lmd, alpha=alpha,
                          layer_indices=layer_indices, residual=False)
    assert out.shape == (B, N, D)
    assert jnp.allclose(out, ref, atol=1e-3, rtol=1e-3)

    # --- single-layer check (exactly one module forward) ----------------------
    lap1, w1 = prepare_gcnii_params(weights[:1], laplacian, lmd=lmd,
                                    alpha=alpha, layer_indices=[2], batch=B)
    out1 = gcnii_stack_forward(x, h0, lap1, w1, alpha=alpha, residual=False)
    ref1 = reference_stack(x, h0, laplacian, weights[:1], lmd=lmd, alpha=alpha,
                           layer_indices=[2], residual=False)
    assert jnp.allclose(jax.block_until_ready(out1), ref1,
                        atol=1e-4, rtol=1e-4)

    # --- residual path ---------------------------------------------------------
    out_r = gcnii_stack_forward(x, h0, lap_f32, w_f32, alpha=alpha,
                                residual=True)
    ref_r = reference_stack(x, h0, laplacian, weights, lmd=lmd, alpha=alpha,
                            layer_indices=layer_indices, residual=True)
    assert jnp.allclose(jax.block_until_ready(out_r), ref_r,
                        atol=1e-3, rtol=1e-3)

    # --- bf16-at-rest parameters + bf16 MXU operands (v5e/v6e/v7x native path) -
    lap_bf, w_bf = prepare_gcnii_params(
        weights, laplacian, lmd=lmd, alpha=alpha,
        layer_indices=layer_indices, batch=B, param_dtype=jnp.bfloat16)
    out_bf = gcnii_stack_forward(x, h0, lap_bf, w_bf, alpha=alpha,
                                 residual=False, matmul_dtype=jnp.bfloat16)
    assert jnp.allclose(jax.block_until_ready(out_bf), ref,
                        atol=5e-2, rtol=5e-2)

    print("KERNEL_OK")
</pallas_src>

<mosaic_0001>
module attributes {stable_mosaic.version = 11 : i64} {
  func.func @_gcnii_stack_kernel(%arg0: memref<64x64xf32, #tpu.memory_space<vmem>>, %arg1: memref<64x64xf32, #tpu.memory_space<vmem>>, %arg2: memref<64x64xf32, #tpu.memory_space<vmem>>, %arg3: memref<4x64x64xf32, #tpu.memory_space<vmem>>, %arg4: memref<64x64xf32, #tpu.memory_space<vmem>>) attributes {dimension_semantics = [], scalar_prefetch = 0 : i64, scratch_operands = 0 : i64, tpu.core_type = #tpu.core_type<tc>} {
    %c0 = arith.constant 0 : index
    %c0_0 = arith.constant 0 : index
    %0 = vector.load %arg2[%c0, %c0_0] : memref<64x64xf32, #tpu.memory_space<vmem>>, vector<64x64xf32>
    %c0_1 = arith.constant 0 : index
    %c0_2 = arith.constant 0 : index
    %1 = vector.load %arg0[%c0_1, %c0_2] : memref<64x64xf32, #tpu.memory_space<vmem>>, vector<64x64xf32>
    %c0_3 = arith.constant 0 : index
    %c0_4 = arith.constant 0 : index
    %2 = vector.load %arg1[%c0_3, %c0_4] : memref<64x64xf32, #tpu.memory_space<vmem>>, vector<64x64xf32>
    %cst = arith.constant 1.000000e-01 : f32
    %3 = vector.broadcast %cst : f32 to vector<64x64xf32>
    %4 = arith.mulf %3, %2 : vector<64x64xf32>
    %c0_5 = arith.constant 0 : index
    %c0_6 = arith.constant 0 : index
    %c0_7 = arith.constant 0 : index
    %5 = vector.load %arg3[%c0_5, %c0_6, %c0_7] : memref<4x64x64xf32, #tpu.memory_space<vmem>>, vector<1x64x64xf32>
    %6 = vector.shape_cast %5 : vector<1x64x64xf32> to vector<64x64xf32>
    %cst_8 = arith.constant dense<0.000000e+00> : vector<64x64xf32>
    %7 = tpu.matmul %0, %1, %cst_8 {dimension_numbers = #tpu.dot_dimension_numbers<[1], [0], [0], [1], [0, 0, 1, 1], [], []>} : vector<64x64xf32>, vector<64x64xf32>, vector<64x64xf32> -> vector<64x64xf32>
    %8 = arith.addf %7, %4 : vector<64x64xf32>
    %cst_9 = arith.constant dense<0.000000e+00> : vector<64x64xf32>
    %9 = tpu.matmul %8, %6, %cst_9 {dimension_numbers = #tpu.dot_dimension_numbers<[1], [0], [0], [1], [0, 0, 1, 1], [], []>} : vector<64x64xf32>, vector<64x64xf32>, vector<64x64xf32> -> vector<64x64xf32>
    %c1 = arith.constant 1 : index
    %c0_10 = arith.constant 0 : index
    %c0_11 = arith.constant 0 : index
    %10 = vector.load %arg3[%c1, %c0_10, %c0_11] : memref<4x64x64xf32, #tpu.memory_space<vmem>>, vector<1x64x64xf32>
    %11 = vector.shape_cast %10 : vector<1x64x64xf32> to vector<64x64xf32>
    %cst_12 = arith.constant dense<0.000000e+00> : vector<64x64xf32>
    %12 = tpu.matmul %0, %9, %cst_12 {dimension_numbers = #tpu.dot_dimension_numbers<[1], [0], [0], [1], [0, 0, 1, 1], [], []>} : vector<64x64xf32>, vector<64x64xf32>, vector<64x64xf32> -> vector<64x64xf32>
    %13 = arith.addf %12, %4 : vector<64x64xf32>
    %cst_13 = arith.constant dense<0.000000e+00> : vector<64x64xf32>
    %14 = tpu.matmul %13, %11, %cst_13 {dimension_numbers = #tpu.dot_dimension_numbers<[1], [0], [0], [1], [0, 0, 1, 1], [], []>} : vector<64x64xf32>, vector<64x64xf32>, vector<64x64xf32> -> vector<64x64xf32>
    %c2 = arith.constant 2 : index
    %c0_14 = arith.constant 0 : index
    %c0_15 = arith.constant 0 : index
    %15 = vector.load %arg3[%c2, %c0_14, %c0_15] : memref<4x64x64xf32, #tpu.memory_space<vmem>>, vector<1x64x64xf32>
    %16 = vector.shape_cast %15 : vector<1x64x64xf32> to vector<64x64xf32>
    %cst_16 = arith.constant dense<0.000000e+00> : vector<64x64xf32>
    %17 = tpu.matmul %0, %14, %cst_16 {dimension_numbers = #tpu.dot_dimension_numbers<[1], [0], [0], [1], [0, 0, 1, 1], [], []>} : vector<64x64xf32>, vector<64x64xf32>, vector<64x64xf32> -> vector<64x64xf32>
    %18 = arith.addf %17, %4 : vector<64x64xf32>
    %cst_17 = arith.constant dense<0.000000e+00> : vector<64x64xf32>
    %19 = tpu.matmul %18, %16, %cst_17 {dimension_numbers = #tpu.dot_dimension_numbers<[1], [0], [0], [1], [0, 0, 1, 1], [], []>} : vector<64x64xf32>, vector<64x64xf32>, vector<64x64xf32> -> vector<64x64xf32>
    %c3 = arith.constant 3 : index
    %c0_18 = arith.constant 0 : index
    %c0_19 = arith.constant 0 : index
    %20 = vector.load %arg3[%c3, %c0_18, %c0_19] : memref<4x64x64xf32, #tpu.memory_space<vmem>>, vector<1x64x64xf32>
    %21 = vector.shape_cast %20 : vector<1x64x64xf32> to vector<64x64xf32>
    %cst_20 = arith.constant dense<0.000000e+00> : vector<64x64xf32>
    %22 = tpu.matmul %0, %19, %cst_20 {dimension_numbers = #tpu.dot_dimension_numbers<[1], [0], [0], [1], [0, 0, 1, 1], [], []>} : vector<64x64xf32>, vector<64x64xf32>, vector<64x64xf32> -> vector<64x64xf32>
    %23 = arith.addf %22, %4 : vector<64x64xf32>
    %cst_21 = arith.constant dense<0.000000e+00> : vector<64x64xf32>
    %24 = tpu.matmul %23, %21, %cst_21 {dimension_numbers = #tpu.dot_dimension_numbers<[1], [0], [0], [1], [0, 0, 1, 1], [], []>} : vector<64x64xf32>, vector<64x64xf32>, vector<64x64xf32> -> vector<64x64xf32>
    %c0_22 = arith.constant 0 : index
    %c0_23 = arith.constant 0 : index
    %25 = vector.load %arg4[%c0_22, %c0_23] : memref<64x64xf32, #tpu.memory_space<vmem>>, vector<64x64xf32>
    tpu.vector_store %arg4[%c0_22, %c0_23], %24 {strides = array<i32>} : memref<64x64xf32, #tpu.memory_space<vmem>>, vector<64x64xf32>,
    return
  }
}

</mosaic_0001>

<bundles_post_ra>
// kernel: tpu_custom_call.1
= control target key start
LH: loop header
LB: loop body
LE: loop exit
PB: predicated region body
PF: predicated region fallthrough
CT: control target
= control target key end

     0   :  { %9 = vsyncpa [#allocation3], 0  ;;  %s2086_s0 = inlined_call_operand.hbm [shape: f32[64,64], index: 0, kind: input, shape index: {}]   ;;  %s2087_s1 = inlined_call_operand.hbm [shape: f32[64,64], index: 1, kind: input, shape index: {}]   ;;  %s2088_s2 = inlined_call_operand.hbm [shape: f32[64,64], index: 2, kind: input, shape index: {}]   ;;  %s2089_s3 = inlined_call_operand.hbm [shape: f32[4,64,64], index: 3, kind: input, shape index: {}]   ;;  %s2090_s4 = inlined_call_operand.hbm [shape: f32[64,64], index: 4, kind: output, shape index: {}]  }
   0x1   :  { %10 = vsyncpa [#allocation6], 0 }
   0x2   :  { %11 = vsyncpa [#allocation9], 0 }
   0x3   :  { %12 = vsyncpa [#allocation4], 0  ;;  %s1797_s15 = smov [#allocation5]   ;;  %s1798_s17 = smov [#allocation2]  }
   0x4   :  { %s30_s16 = sshll.u32 %s1797_s15, 4  ;;  %s18_s18 = sshll.u32 %s1798_s17, 4  ;;  %s31_s16 = int_to_ptr.vmem [resolvable:$true] %s30_s16  ;;  %s1829_s18 = int_to_ptr.vmem [resolvable:$true] %s18_s18 }
   0x5   :  { %s1679_s21 = scalar_lea.hbm %s2087_s1, 1024 }
   0x6   :  { %p1680_p0 = scmp.ne.s32.totalorder %s2087_s1, %s1679_s21  ;;  %p1683_p1 = scmp.lt.u32.totalorder %s1679_s21, %s2087_s1 }
   0x8   :  { %p1685_p2 = pnand %p1683_p1, %p1680_p0 }
   0xa   :  { %1688 = shalt.err (!%p1685_p2)
}
   0xb   :  { %s1689_s26 = scalar_lea.vmem %s31_s16, 1024  ;;  %p1694_p4 = scmp.lt.s32.totalorder %s31_s16, %s31_s16 }
   0xc   :  { %p1690_p3 = scmp.ne.s32.totalorder %s31_s16, %s1689_s26  ;;  %p1695_p5 = scmp.lt.s32.totalorder %s1689_s26, %s1689_s26 }
   0xe   :  { %p1696_p6 = por %p1695_p5, %p1694_p4 }
  0x10   :  { %p1697_p7 = pnand %p1696_p6, %p1690_p3 }
  0x12   :  { %1700 = shalt.err (!%p1697_p7)
}
  0x13   :  { %s1799_s27 = smov 128   ;;  %s1800_s28 = smov 8  }
  0x14   :  { %36 = dma.hbm_to_vmem [thread:$0]  %s2087_s1, 1024, %s31_s16, [#allocation6], %s1799_s27, %s1799_s27, %s1800_s28  }
  0x15   :  { %s1701_s7 = scalar_lea.hbm %s2086_s0, 1024 }
  0x16   :  { %p1702_p8 = scmp.ne.s32.totalorder %s2086_s0, %s1701_s7  ;;  %p1705_p9 = scmp.lt.u32.totalorder %s1701_s7, %s2086_s0 }
  0x18   :  { %p1707_p10 = pnand %p1705_p9, %p1702_p8 }
  0x1a   :  { %1710 = shalt.err (!%p1707_p10)
}
  0x1b   :  { %s1711_s12 = scalar_lea.vmem %s1829_s18, 1024  ;;  %p1716_p12 = scmp.lt.s32.totalorder %s1829_s18, %s1829_s18 }
  0x1c   :  { %p1712_p11 = scmp.ne.s32.totalorder %s1829_s18, %s1711_s12  ;;  %p1717_p13 = scmp.lt.s32.totalorder %s1711_s12, %s1711_s12 }
  0x1e   :  { %p1718_p0 = por %p1717_p13, %p1716_p12 }
  0x20   :  { %p1719_p1 = pnand %p1718_p0, %p1712_p11 }
  0x22   :  { %1722 = shalt.err (!%p1719_p1)
}
  0x23   :  { %24 = dma.hbm_to_vmem [thread:$0]  %s2086_s0, 1024, %s1829_s18, [#allocation3], %s1799_s27, %s1799_s27, %s1800_s28  }
  0x24   :  { %s1801_s14 = smov [#allocation7]   ;;  %s1802_s16 = smov [#allocation8]  }
  0x25   :  { %s42_s15 = sshll.u32 %s1801_s14, 4  ;;  %s54_s17 = sshll.u32 %s1802_s16, 4  ;;  %s43_s15 = int_to_ptr.vmem [resolvable:$true] %s42_s15  ;;  %s1866_s17 = int_to_ptr.vmem [resolvable:$true] %s54_s17 }
  0x26   :  { %s1723_s21 = scalar_lea.hbm %s2088_s2, 1024 }
  0x27   :  { %p1724_p2 = scmp.ne.s32.totalorder %s2088_s2, %s1723_s21  ;;  %p1727_p3 = scmp.lt.u32.totalorder %s1723_s21, %s2088_s2 }
  0x29   :  { %p1729_p4 = pnand %p1727_p3, %p1724_p2 }
  0x2b   :  { %1732 = shalt.err (!%p1729_p4)
}
  0x2c   :  { %s1733_s0 = scalar_lea.vmem %s43_s15, 1024  ;;  %p1738_p6 = scmp.lt.s32.totalorder %s43_s15, %s43_s15 }
  0x2d   :  { %p1734_p5 = scmp.ne.s32.totalorder %s43_s15, %s1733_s0  ;;  %p1739_p7 = scmp.lt.s32.totalorder %s1733_s0, %s1733_s0 }
  0x2f   :  { %p1740_p8 = por %p1739_p7, %p1738_p6 }
  0x31   :  { %p1741_p9 = pnand %p1740_p8, %p1734_p5 }
  0x33   :  { %1744 = shalt.err (!%p1741_p9)
}
  0x34   :  { %48 = dma.hbm_to_vmem [thread:$0]  %s2088_s2, 1024, %s43_s15, [#allocation6], %s1799_s27, %s1799_s27, %s1800_s28  }
  0x35   :  { %s1745_s5 = scalar_lea.hbm %s2089_s3, 4096 }
  0x36   :  { %p1746_p10 = scmp.ne.s32.totalorder %s2089_s3, %s1745_s5  ;;  %p1749_p11 = scmp.lt.u32.totalorder %s1745_s5, %s2089_s3 }
  0x38   :  { %p1751_p12 = pnand %p1749_p11, %p1746_p10 }
  0x3a   :  { %1754 = shalt.err (!%p1751_p12)
}
  0x3b   :  { %s1755_s10 = scalar_lea.vmem %s1866_s17, 4096  ;;  %p1760_p0 = scmp.lt.s32.totalorder %s1866_s17, %s1866_s17 }
  0x3c   :  { %p1756_p13 = scmp.ne.s32.totalorder %s1866_s17, %s1755_s10  ;;  %p1761_p1 = scmp.lt.s32.totalorder %s1755_s10, %s1755_s10 }
  0x3e   :  { %p1762_p2 = por %p1761_p1, %p1760_p0 }
  0x40   :  { %p1763_p3 = pnand %p1762_p2, %p1756_p13 }
  0x42   :  { %1766 = shalt.err (!%p1763_p3)
}
  0x43   :  { %60 = dma.hbm_to_vmem [thread:$0]  %s2089_s3, 4096, %s1866_s17, [#allocation9], %s1799_s27, %s1799_s27, %s1800_s28  }
  0x44   :  { %1789 = dma.done.wait [#allocation3], 1024  }
  0x45   :  { %1790 = vsyncadd [#allocation3], 4294966272 }
  0x46   :  { %1791 = dma.done.wait [#allocation6], 2048  }
  0x47   :  { %1792 = vsyncadd [#allocation6], 4294965248 }
  0x48   :  { %1793 = dma.done.wait [#allocation9], 4096  }
  0x49   :  { %1794 = vsyncadd [#allocation9], 4294963200  ;;  %v81_v0 = vld [vmem:[#allocation2] sm:$0xff]  ;;  %v82_v1 = vld [vmem:[#allocation2 + $0x8] sm:$0xff]  ;;  %vm113_vm0 = vcmask 523264   ;;  %s1803_s3 = smov [#allocation10]  }
  0x4a   :  { %v83_v2 = vld [vmem:[#allocation2 + $0x10] sm:$0xff]  ;;  %v1544_v3 = vpack.c.bf16 %v82_v1, %v81_v0  ;;  %v84_v4 = vld [vmem:[#allocation2 + $0x18] sm:$0xff]  ;;  %v85_v6 = vld [vmem:[#allocation2 + $0x20] sm:$0xff]  ;;  %s1114_s12 = sshll.u32 %s1803_s3, 4  ;;  %s1115_s12 = int_to_ptr.vmem [resolvable:$true] %s1114_s12 }
  0x4b   :  { %v1548_v5 = vpack.c.bf16 %v84_v4, %v83_v2  ;;  %v86_v7 = vld [vmem:[#allocation2 + $0x28] sm:$0xff]  ;;  %v1903_v8 = vld [vmem:[#allocation7] sm:$0xff]  ;;  %v87_v10 = vld [vmem:[#allocation2 + $0x30] sm:$0xff]  ;;  %s1767_s1 = scalar_lea.vmem %s1115_s12, 1024  ;;  %p1772_p5 = scmp.lt.s32.totalorder %s1115_s12, %s1115_s12 }
  0x4c   :  { %1545 = vmatprep.subr.bf16.mxu0 %v1544_v3  ;;  %1336 = vmatprep.mubr.msk.f32.mxu0 %vm113_vm0, %v1903_v8  ;;  %v1552_v9 = vpack.c.bf16 %v86_v7, %v85_v6  ;;  %v105_v11 = vld [vmem:[#allocation8] sm:$0xff]  ;;  %v106_v12 = vld [vmem:[#allocation8 + $0x8] sm:$0xff]  ;;  %v88_v13 = vld [vmem:[#allocation2 + $0x38] sm:$0xff]  ;;  %p1768_p4 = scmp.ne.s32.totalorder %s1115_s12, %s1767_s1  ;;  %p1773_p6 = scmp.lt.s32.totalorder %s1767_s1, %s1767_s1 }
  0x4d   :  { %1547 = vmatpush3.bf16.msra.mxu0 %v1544_v3  ;;  %v1560_v14 = vpack.c.bf16 %v106_v12, %v105_v11  ;;  %v107_v15 = vld [vmem:[#allocation8 + $0x10] sm:$0xff]  ;;  %v108_v16 = vld [vmem:[#allocation8 + $0x18] sm:$0xff]  ;;  %v109_v18 = vld [vmem:[#allocation8 + $0x20] sm:$0xff]  ;;  %v1556_v20 = vpack.c.bf16 %v88_v13, %v87_v10 }
  0x4e   :  { %1549 = vmatprep.subr.bf16.mxu0 %v1548_v5  ;;  %v1564_v17 = vpack.c.bf16 %v108_v16, %v107_v15  ;;  %v110_v19 = vld [vmem:[#allocation8 + $0x28] sm:$0xff]  ;;  %v1909_v23 = vld [vmem:[#allocation7 + $0x10] sm:$0xff]  ;;  %v1915_v24 = vld [vmem:[#allocation7 + $0x18] sm:$0xff]  ;;  %p1774_p7 = por %p1773_p6, %p1772_p5 }
  0x4f   :  { %1561 = vmatprep.subr.bf16.mxu1 %v1560_v14  ;;  %v1568_v21 = vpack.c.bf16 %v110_v19, %v109_v18  ;;  %v1907_v22 = vld [vmem:[#allocation7 + $0x8] sm:$0xff]  ;;  %v1917_v25 = vld [vmem:[#allocation7 + $0x20] sm:$0xff]  ;;  %v1925_v27 = vld [vmem:[#allocation7 + $0x30] sm:$0xff] }
  0x50   :  { %1563 = vmatpush3.bf16.msra.mxu1 %v1560_v14  ;;  %v1923_v26 = vld [vmem:[#allocation7 + $0x28] sm:$0xff]  ;;  %v1931_v28 = vld [vmem:[#allocation7 + $0x38] sm:$0xff]  ;;  %v111_v29 = vld [vmem:[#allocation8 + $0x30] sm:$0xff]  ;;  %p1775_p8 = pnand %p1774_p7, %p1768_p4 }
  0x51   :  { %1551 = vmatpush3.bf16.msra.mxu0 %v1548_v5  ;;  %1565 = vmatprep.subr.bf16.mxu1 %v1564_v17  ;;  %v112_v30 = vld [vmem:[#allocation8 + $0x38] sm:$0xff]  ;;  %v89_v32 = vld [vmem:[#allocation5] sm:$0xff]  ;;  %v90_v33 = vld [vmem:[#allocation5 + $0x8] sm:$0xff] }
  0x52   :  { %1553 = vmatprep.subr.bf16.mxu0 %v1552_v9  ;;  %v1572_v31 = vpack.c.bf16 %v112_v30, %v111_v29  ;;  %v1937_v34 = vmul.f32 0.1, %v89_v32  ;;  %v1939_v35 = vmul.f32 0.1, %v90_v33  ;;  %v91_v36 = vld [vmem:[#allocation5 + $0x10] sm:$0xff]  ;;  %v92_v38 = vld [vmem:[#allocation5 + $0x18] sm:$0xff] }
  0x53   :  { %v1942_v41 = vmul.f32 0.1, %v91_v36  ;;  %v1945_v43 = vmul.f32 0.1, %v92_v38  ;;  %v93_v44 = vld [vmem:[#allocation5 + $0x20] sm:$0xff]  ;;  %v94_v46 = vld [vmem:[#allocation5 + $0x28] sm:$0xff] }
  0x54   :  { %1567 = vmatpush3.bf16.msra.mxu1 %v1564_v17  ;;  %v1950_v49 = vmul.f32 0.1, %v93_v44  ;;  %v1953_v51 = vmul.f32 0.1, %v94_v46  ;;  %v95_v52 = vld [vmem:[#allocation5 + $0x30] sm:$0xff]  ;;  %v96_v54 = vld [vmem:[#allocation5 + $0x38] sm:$0xff] }
  0x55   :  { %1555 = vmatpush3.bf16.msra.mxu0 %v1552_v9  ;;  %1569 = vmatprep.subr.bf16.mxu1 %v1568_v21  ;;  %v1958_v57 = vmul.f32 0.1, %v95_v52  ;;  %v1961_v59 = vmul.f32 0.1, %v96_v54  ;;  %v373_v0 = vld [vmem:[#allocation8 + $0x40] sm:$0xff]  ;;  %v374_v1 = vld [vmem:[#allocation8 + $0x48] sm:$0xff] }
  0x56   :  { %1557 = vmatprep.subr.bf16.mxu0 %v1556_v20  ;;  %v375_v2 = vld [vmem:[#allocation8 + $0x50] sm:$0xff]  ;;  %v1592_v3 = vpack.c.bf16 %v374_v1, %v373_v0  ;;  %v376_v4 = vld [vmem:[#allocation8 + $0x58] sm:$0xff]  ;;  %v377_v6 = vld [vmem:[#allocation8 + $0x60] sm:$0xff] }
  0x57   :  { %v1596_v5 = vpack.c.bf16 %v376_v4, %v375_v2  ;;  %v378_v7 = vld [vmem:[#allocation8 + $0x68] sm:$0xff]  ;;  %v379_v29 = vld [vmem:[#allocation8 + $0x70] sm:$0xff]  ;;  %v380_v30 = vld [vmem:[#allocation8 + $0x78] sm:$0xff] }
  0x58   :  { %1571 = vmatpush3.bf16.msra.mxu1 %v1568_v21  ;;  %v1600_v9 = vpack.c.bf16 %v378_v7, %v377_v6  ;;  %v616_v54 = vld [vmem:[#allocation8 + $0x80] sm:$0xff] }
  0x59   :  { %1559 = vmatpush3.bf16.msra.mxu0 %v1556_v20  ;;  %1573 = vmatprep.subr.bf16.mxu1 %v1572_v31 }
  0x5c   :  { %1337 = vmatmul.mubr.msk.f32.vlgmr.msra.gmra.mrb[0].mxu0 %vm113_vm0, %v1907_v22  ;;  %1575 = vmatpush3.bf16.msra.mxu1 %v1572_v31  ;;  %v1604_v31 = vpack.c.bf16 %v380_v30, %v379_v29 }
  0x5d   :  { %1339 = vmatprep.mubr.msk.f32.mxu0 %vm113_vm0, %v1909_v23  ;;  %1593 = vmatprep.subr.bf16.mxu1 %v1592_v3 }
  0x60   :  { %1340 = vmatmul.mubr.msk.f32.gmra.mrb[2].mxu0 %vm113_vm0, %v1915_v24 }
  0x61   :  { %1342 = vmatprep.mubr.msk.f32.mxu0 %vm113_vm0, %v1917_v25 }
  0x64   :  { %1343 = vmatmul.mubr.msk.f32.gmra.mrb[4].mxu0 %vm113_vm0, %v1923_v26 }
  0x65   :  { %1345 = vmatprep.mubr.msk.f32.mxu0 %vm113_vm0, %v1925_v27 }
  0x68   :  { %1346 = vmatmul.mubr.msk.f32.gmra.mrb[6].mxu0 %vm113_vm0, %v1931_v28 }
  0x69   :  { %1392 = vmatprep.mubr.msk.f32.mxu0 %vm113_vm0, %v1903_v8 }
 0x12f   :  { %v1338_v37 = vpop.f32.mrb[0].mxu0 }
 0x130   :  { %v204_v39 = vpop.f32.mrb[1].mxu0  ;;  %v210_v42 = vadd.f32 %v1338_v37, %v1939_v35 }
 0x131   :  { %v205_v40 = vadd.f32 %v204_v39, %v1937_v34 }
 0x133   :  { %v1341_v45 = vpop.f32.mrb[2].mxu0  ;;  %1364 = vmatprep.mubr.msk.f32.mxu1 %vm113_vm0, %v205_v40 }
 0x134   :  { %v214_v47 = vpop.f32.mrb[3].mxu0  ;;  %1365 = vmatmul.mubr.msk.f32.vlgmr.msra.gmra.mrb[0].mxu1 %vm113_vm0, %v210_v42  ;;  %v220_v50 = vadd.f32 %v1341_v45, %v1945_v43 }
 0x135   :  { %v215_v48 = vadd.f32 %v214_v47, %v1942_v41  ;;  %1595 = vmatpush3.bf16.msra.mxu1 %v1592_v3 }
 0x136   :  { %1597 = vmatprep.subr.bf16.mxu1 %v1596_v5 }
 0x137   :  { %v1344_v53 = vpop.f32.mrb[4].mxu0  ;;  %1367 = vmatprep.mubr.msk.f32.mxu1 %vm113_vm0, %v215_v48 }
 0x138   :  { %v224_v55 = vpop.f32.mrb[5].mxu0  ;;  %1368 = vmatmul.mubr.msk.f32.gmra.mrb[2].mxu1 %vm113_vm0, %v220_v50  ;;  %v230_v58 = vadd.f32 %v1344_v53, %v1953_v51 }
 0x139   :  { %v225_v56 = vadd.f32 %v224_v55, %v1950_v49  ;;  %1599 = vmatpush3.bf16.msra.mxu1 %v1596_v5  ;;  %v617_v55 = vld [vmem:[#allocation8 + $0x88] sm:$0xff] }
 0x13a   :  { %1601 = vmatprep.subr.bf16.mxu1 %v1600_v9 }
 0x13b   :  { %v1347_v60 = vpop.f32.mrb[6].mxu0  ;;  %1370 = vmatprep.mubr.msk.f32.mxu1 %vm113_vm0, %v225_v56  ;;  %v618_v56 = vld [vmem:[#allocation8 + $0x90] sm:$0xff] }
 0x13c   :  { %v234_v61 = vpop.f32.mrb[7].mxu0  ;;  %1371 = vmatmul.mubr.msk.f32.gmra.mrb[4].mxu1 %vm113_vm0, %v230_v58  ;;  %v240_v63 = vadd.f32 %v1347_v60, %v1961_v59  ;;  %v1624_v58 = vpack.c.bf16 %v617_v55, %v616_v54  ;;  %v619_v60 = vld [vmem:[#allocation8 + $0x98] sm:$0xff] }
 0x13d   :  { %v235_v62 = vadd.f32 %v234_v61, %v1958_v57  ;;  %1603 = vmatpush3.bf16.msra.mxu1 %v1600_v9  ;;  %v1628_v61 = vpack.c.bf16 %v619_v60, %v618_v56 }
 0x13e   :  { %1605 = vmatprep.subr.bf16.mxu1 %v1604_v31 }
 0x13f   :  { %1373 = vmatprep.mubr.msk.f32.mxu1 %vm113_vm0, %v235_v62  ;;  %v620_v62 = vld [vmem:[#allocation8 + $0xa0] sm:$0xff] }
 0x140   :  { %1374 = vmatmul.mubr.msk.f32.gmra.mrb[6].mxu1 %vm113_vm0, %v240_v63  ;;  %v621_v63 = vld [vmem:[#allocation8 + $0xa8] sm:$0xff] }
 0x141   :  { %1607 = vmatpush3.bf16.msra.mxu1 %v1604_v31  ;;  %v1632_v0 = vpack.c.bf16 %v621_v63, %v620_v62 }
 0x142   :  { %1625 = vmatprep.subr.bf16.mxu1 %v1624_v58 }
 0x207   :  { %v1366_v10 = vpop.f32.mrb[0].mxu1 }
 0x208   :  { %v333_v11 = vpop.f32.mrb[1].mxu1 }
 0x209   :  { %v1576_v12 = vpack.c.bf16 %v1366_v10, %v333_v11 }
 0x20b   :  { %v1369_v13 = vpop.f32.mrb[2].mxu1  ;;  %1577 = vmatprep.subr.bf16.mxu0 %v1576_v12 }
 0x20c   :  { %v343_v14 = vpop.f32.mrb[3].mxu1  ;;  %1579 = vmatpush3.bf16.msra.mxu0 %v1576_v12 }
 0x20d   :  { %v1580_v15 = vpack.c.bf16 %v1369_v13, %v343_v14  ;;  %v622_v14 = vld [vmem:[#allocation8 + $0xb0] sm:$0xff] }
 0x20f   :  { %v1372_v16 = vpop.f32.mrb[4].mxu1  ;;  %1581 = vmatprep.subr.bf16.mxu0 %v1580_v15 }
 0x210   :  { %v353_v17 = vpop.f32.mrb[5].mxu1  ;;  %1583 = vmatpush3.bf16.msra.mxu0 %v1580_v15  ;;  %v623_v15 = vld [vmem:[#allocation8 + $0xb8] sm:$0xff] }
 0x211   :  { %v1584_v18 = vpack.c.bf16 %v1372_v16, %v353_v17  ;;  %v1636_v16 = vpack.c.bf16 %v623_v15, %v622_v14 }
 0x213   :  { %v1375_v19 = vpop.f32.mrb[6].mxu1  ;;  %1585 = vmatprep.subr.bf16.mxu0 %v1584_v18 }
 0x214   :  { %v363_v20 = vpop.f32.mrb[7].mxu1  ;;  %1587 = vmatpush3.bf16.msra.mxu0 %v1584_v18 }
 0x215   :  { %v1588_v21 = vpack.c.bf16 %v1375_v19, %v363_v20 }
 0x217   :  { %1589 = vmatprep.subr.bf16.mxu0 %v1588_v21 }
 0x218   :  { %1591 = vmatpush3.bf16.msra.mxu0 %v1588_v21 }
 0x21b   :  { %1393 = vmatmul.mubr.msk.f32.vlgmr.msra.gmra.mrb[8].mxu0 %vm113_vm0, %v1907_v22 }
 0x21c   :  { %1395 = vmatprep.mubr.msk.f32.mxu0 %vm113_vm0, %v1909_v23 }
 0x21f   :  { %1396 = vmatmul.mubr.msk.f32.gmra.mrb[10].mxu0 %vm113_vm0, %v1915_v24 }
 0x220   :  { %1398 = vmatprep.mubr.msk.f32.mxu0 %vm113_vm0, %v1917_v25 }
 0x223   :  { %1399 = vmatmul.mubr.msk.f32.gmra.mrb[12].mxu0 %vm113_vm0, %v1923_v26 }
 0x224   :  { %1401 = vmatprep.mubr.msk.f32.mxu0 %vm113_vm0, %v1925_v27 }
 0x227   :  { %1402 = vmatmul.mubr.msk.f32.gmra.mrb[14].mxu0 %vm113_vm0, %v1931_v28 }
 0x228   :  { %1448 = vmatprep.mubr.msk.f32.mxu0 %vm113_vm0, %v1903_v8 }
 0x2ee   :  { %v1394_v32 = vpop.f32.mrb[8].mxu0 }
 0x2ef   :  { %v447_v33 = vpop.f32.mrb[9].mxu0  ;;  %v453_v37 = vadd.f32 %v1394_v32, %v1939_v35 }
 0x2f0   :  { %v448_v36 = vadd.f32 %v447_v33, %v1937_v34 }
 0x2f2   :  { %v1397_v38 = vpop.f32.mrb[10].mxu0  ;;  %1420 = vmatprep.mubr.msk.f32.mxu1 %vm113_vm0, %v448_v36 }
 0x2f3   :  { %v457_v39 = vpop.f32.mrb[11].mxu0  ;;  %1421 = vmatmul.mubr.msk.f32.vlgmr.msra.gmra.mrb[8].mxu1 %vm113_vm0, %v453_v37  ;;  %v463_v42 = vadd.f32 %v1397_v38, %v1945_v43 }
 0x2f4   :  { %v458_v40 = vadd.f32 %v457_v39, %v1942_v41  ;;  %1627 = vmatpush3.bf16.msra.mxu1 %v1624_v58 }
 0x2f5   :  { %1629 = vmatprep.subr.bf16.mxu1 %v1628_v61 }
 0x2f6   :  { %v1400_v44 = vpop.f32.mrb[12].mxu0  ;;  %1423 = vmatprep.mubr.msk.f32.mxu1 %vm113_vm0, %v458_v40 }
 0x2f7   :  { %v467_v45 = vpop.f32.mrb[13].mxu0  ;;  %1424 = vmatmul.mubr.msk.f32.gmra.mrb[10].mxu1 %vm113_vm0, %v463_v42  ;;  %v473_v47 = vadd.f32 %v1400_v44, %v1953_v51  ;;  %v859_v42 = vld [vmem:[#allocation8 + $0xc0] sm:$0xff]  ;;  %v860_v44 = vld [vmem:[#allocation8 + $0xc8] sm:$0xff] }
 0x2f8   :  { %v468_v46 = vadd.f32 %v467_v45, %v1950_v49  ;;  %1631 = vmatpush3.bf16.msra.mxu1 %v1628_v61  ;;  %v861_v45 = vld [vmem:[#allocation8 + $0xd0] sm:$0xff] }
 0x2f9   :  { %1633 = vmatprep.subr.bf16.mxu1 %v1632_v0 }
 0x2fa   :  { %v1403_v48 = vpop.f32.mrb[14].mxu0  ;;  %1426 = vmatprep.mubr.msk.f32.mxu1 %vm113_vm0, %v468_v46  ;;  %v1656_v46 = vpack.c.bf16 %v860_v44, %v859_v42 }
 0x2fb   :  { %v477_v50 = vpop.f32.mrb[15].mxu0  ;;  %1427 = vmatmul.mubr.msk.f32.gmra.mrb[12].mxu1 %vm113_vm0, %v473_v47  ;;  %v483_v53 = vadd.f32 %v1403_v48, %v1961_v59  ;;  %v862_v47 = vld [vmem:[#allocation8 + $0xd8] sm:$0xff] }
 0x2fc   :  { %v478_v52 = vadd.f32 %v477_v50, %v1958_v57  ;;  %1635 = vmatpush3.bf16.msra.mxu1 %v1632_v0  ;;  %v1660_v48 = vpack.c.bf16 %v862_v47, %v861_v45  ;;  %v863_v50 = vld [vmem:[#allocation8 + $0xe0] sm:$0xff] }
 0x2fd   :  { %1637 = vmatprep.subr.bf16.mxu1 %v1636_v16 }
 0x2fe   :  { %1429 = vmatprep.mubr.msk.f32.mxu1 %vm113_vm0, %v478_v52  ;;  %v864_v52 = vld [vmem:[#allocation8 + $0xe8] sm:$0xff] }
 0x2ff   :  { %1430 = vmatmul.mubr.msk.f32.gmra.mrb[14].mxu1 %vm113_vm0, %v483_v53  ;;  %v1664_v53 = vpack.c.bf16 %v864_v52, %v863_v50 }
 0x300   :  { %1639 = vmatpush3.bf16.msra.mxu1 %v1636_v16 }
 0x301   :  { %1657 = vmatprep.subr.bf16.mxu1 %v1656_v46 }
 0x3c6   :  { %v1422_v1 = vpop.f32.mrb[8].mxu1 }
 0x3c7   :  { %v576_v2 = vpop.f32.mrb[9].mxu1 }
 0x3c8   :  { %v1608_v3 = vpack.c.bf16 %v1422_v1, %v576_v2 }
 0x3ca   :  { %v1425_v4 = vpop.f32.mrb[10].mxu1  ;;  %1609 = vmatprep.subr.bf16.mxu0 %v1608_v3 }
 0x3cb   :  { %v586_v5 = vpop.f32.mrb[11].mxu1  ;;  %1611 = vmatpush3.bf16.msra.mxu0 %v1608_v3 }
 0x3cc   :  { %v1612_v6 = vpack.c.bf16 %v1425_v4, %v586_v5  ;;  %v865_v4 = vld [vmem:[#allocation8 + $0xf0] sm:$0xff] }
 0x3ce   :  { %v1428_v7 = vpop.f32.mrb[12].mxu1  ;;  %1613 = vmatprep.subr.bf16.mxu0 %v1612_v6 }
 0x3cf   :  { %v596_v9 = vpop.f32.mrb[13].mxu1  ;;  %1615 = vmatpush3.bf16.msra.mxu0 %v1612_v6 }
 0x3d0   :  { %v1616_v10 = vpack.c.bf16 %v1428_v7, %v596_v9 }
 0x3d2   :  { %v1431_v11 = vpop.f32.mrb[14].mxu1  ;;  %1617 = vmatprep.subr.bf16.mxu0 %v1616_v10 }
 0x3d3   :  { %v606_v12 = vpop.f32.mrb[15].mxu1  ;;  %1619 = vmatpush3.bf16.msra.mxu0 %v1616_v10 }
 0x3d4   :  { %v1620_v13 = vpack.c.bf16 %v1431_v11, %v606_v12 }
 0x3d6   :  { %1621 = vmatprep.subr.bf16.mxu0 %v1620_v13 }
 0x3d7   :  { %1623 = vmatpush3.bf16.msra.mxu0 %v1620_v13 }
 0x3da   :  { %1449 = vmatmul.mubr.msk.f32.vlgmr.msra.gmra.mrb[16].mxu0 %vm113_vm0, %v1907_v22 }
 0x3db   :  { %1451 = vmatprep.mubr.msk.f32.mxu0 %vm113_vm0, %v1909_v23 }
 0x3de   :  { %1452 = vmatmul.mubr.msk.f32.gmra.mrb[18].mxu0 %vm113_vm0, %v1915_v24 }
 0x3df   :  { %1454 = vmatprep.mubr.msk.f32.mxu0 %vm113_vm0, %v1917_v25 }
 0x3e2   :  { %1455 = vmatmul.mubr.msk.f32.gmra.mrb[20].mxu0 %vm113_vm0, %v1923_v26 }
 0x3e3   :  { %1457 = vmatprep.mubr.msk.f32.mxu0 %vm113_vm0, %v1925_v27 }
 0x3e6   :  { %1458 = vmatmul.mubr.msk.f32.gmra.mrb[22].mxu0 %vm113_vm0, %v1931_v28 }
 0x3e7   :  { %1504 = vmatprep.mubr.msk.f32.mxu0 %vm113_vm0, %v1903_v8 }
 0x4ad   :  { %v1450_v17 = vpop.f32.mrb[16].mxu0 }
 0x4ae   :  { %v690_v18 = vpop.f32.mrb[17].mxu0  ;;  %v696_v20 = vadd.f32 %v1450_v17, %v1939_v35 }
 0x4af   :  { %v691_v19 = vadd.f32 %v690_v18, %v1937_v34 }
 0x4b1   :  { %v1453_v21 = vpop.f32.mrb[18].mxu0  ;;  %1476 = vmatprep.mubr.msk.f32.mxu1 %vm113_vm0, %v691_v19 }
 0x4b2   :  { %v700_v29 = vpop.f32.mrb[19].mxu0  ;;  %1477 = vmatmul.mubr.msk.f32.vlgmr.msra.gmra.mrb[16].mxu1 %vm113_vm0, %v696_v20  ;;  %v706_v8 = vadd.f32 %v1453_v21, %v1945_v43 }
 0x4b3   :  { %v701_v30 = vadd.f32 %v700_v29, %v1942_v41  ;;  %1659 = vmatpush3.bf16.msra.mxu1 %v1656_v46 }
 0x4b4   :  { %1661 = vmatprep.subr.bf16.mxu1 %v1660_v48 }
 0x4b5   :  { %v1456_v31 = vpop.f32.mrb[20].mxu0  ;;  %1479 = vmatprep.mubr.msk.f32.mxu1 %vm113_vm0, %v701_v30 }
 0x4b6   :  { %v710_v32 = vpop.f32.mrb[21].mxu0  ;;  %1480 = vmatmul.mubr.msk.f32.gmra.mrb[18].mxu1 %vm113_vm0, %v706_v8  ;;  %v716_v36 = vadd.f32 %v1456_v31, %v1953_v51 }
 0x4b7   :  { %v711_v33 = vadd.f32 %v710_v32, %v1950_v49  ;;  %1663 = vmatpush3.bf16.msra.mxu1 %v1660_v48 }
 0x4b8   :  { %1665 = vmatprep.subr.bf16.mxu1 %v1664_v53 }
 0x4b9   :  { %v1459_v37 = vpop.f32.mrb[22].mxu0  ;;  %1482 = vmatprep.mubr.msk.f32.mxu1 %vm113_vm0, %v711_v33 }
 0x4ba   :  { %v720_v38 = vpop.f32.mrb[23].mxu0  ;;  %1483 = vmatmul.mubr.msk.f32.gmra.mrb[20].mxu1 %vm113_vm0, %v716_v36  ;;  %v726_v40 = vadd.f32 %v1459_v37, %v1961_v59 }
 0x4bb   :  { %v721_v39 = vadd.f32 %v720_v38, %v1958_v57  ;;  %1667 = vmatpush3.bf16.msra.mxu1 %v1664_v53 }
 0x4bd   :  { %1485 = vmatprep.mubr.msk.f32.mxu1 %vm113_vm0, %v721_v39 }
 0x4be   :  { %1486 = vmatmul.mubr.msk.f32.gmra.mrb[22].mxu1 %vm113_vm0, %v726_v40 }
 0x585   :  { %v1478_v54 = vpop.f32.mrb[16].mxu1 }
 0x586   :  { %v819_v55 = vpop.f32.mrb[17].mxu1 }
 0x587   :  { %v1640_v56 = vpack.c.bf16 %v1478_v54, %v819_v55 }
 0x589   :  { %v1481_v58 = vpop.f32.mrb[18].mxu1  ;;  %1641 = vmatprep.subr.bf16.mxu0 %v1640_v56 }
 0x58a   :  { %v829_v60 = vpop.f32.mrb[19].mxu1  ;;  %1643 = vmatpush3.bf16.msra.mxu0 %v1640_v56 }
 0x58b   :  { %v1644_v61 = vpack.c.bf16 %v1481_v58, %v829_v60 }
 0x58d   :  { %v1484_v62 = vpop.f32.mrb[20].mxu1  ;;  %1645 = vmatprep.subr.bf16.mxu0 %v1644_v61 }
 0x58e   :  { %v839_v63 = vpop.f32.mrb[21].mxu1  ;;  %1647 = vmatpush3.bf16.msra.mxu0 %v1644_v61 }
 0x58f   :  { %v1648_v0 = vpack.c.bf16 %v1484_v62, %v839_v63 }
 0x591   :  { %v1487_v1 = vpop.f32.mrb[22].mxu1  ;;  %1649 = vmatprep.subr.bf16.mxu0 %v1648_v0 }
 0x592   :  { %v849_v2 = vpop.f32.mrb[23].mxu1  ;;  %1651 = vmatpush3.bf16.msra.mxu0 %v1648_v0 }
 0x593   :  { %v1652_v3 = vpack.c.bf16 %v1487_v1, %v849_v2 }
 0x595   :  { %1653 = vmatprep.subr.bf16.mxu0 %v1652_v3 }
 0x596   :  { %1655 = vmatpush3.bf16.msra.mxu0 %v1652_v3 }
 0x599   :  { %1505 = vmatmul.mubr.msk.f32.vlgmr.msra.gmra.mrb[24].mxu0 %vm113_vm0, %v1907_v22  ;;  %v866_v22 = vld [vmem:[#allocation8 + $0xf8] sm:$0xff] }
 0x59a   :  { %1507 = vmatprep.mubr.msk.f32.mxu0 %vm113_vm0, %v1909_v23  ;;  %v1668_v5 = vpack.c.bf16 %v866_v22, %v865_v4 }
 0x59c   :  { %1669 = vmatprep.subr.bf16.mxu1 %v1668_v5 }
 0x59d   :  { %1508 = vmatmul.mubr.msk.f32.gmra.mrb[26].mxu0 %vm113_vm0, %v1915_v24  ;;  %1671 = vmatpush3.bf16.msra.mxu1 %v1668_v5 }
 0x59e   :  { %1510 = vmatprep.mubr.msk.f32.mxu0 %vm113_vm0, %v1917_v25 }
 0x5a1   :  { %1511 = vmatmul.mubr.msk.f32.gmra.mrb[28].mxu0 %vm113_vm0, %v1923_v26 }
 0x5a2   :  { %1513 = vmatprep.mubr.msk.f32.mxu0 %vm113_vm0, %v1925_v27 }
 0x5a5   :  { %1514 = vmatmul.mubr.msk.f32.gmra.mrb[30].mxu0 %vm113_vm0, %v1931_v28 }
 0x66c   :  { %v1506_v23 = vpop.f32.mrb[24].mxu0 }
 0x66d   :  { %v933_v6 = vpop.f32.mrb[25].mxu0  ;;  %v939_v25 = vadd.f32 %v1506_v23, %v1939_v35 }
 0x66e   :  { %v934_v24 = vadd.f32 %v933_v6, %v1937_v34 }
 0x670   :  { %v1509_v7 = vpop.f32.mrb[26].mxu0  ;;  %1532 = vmatprep.mubr.msk.f32.mxu1 %vm113_vm0, %v934_v24 }
 0x671   :  { %v943_v26 = vpop.f32.mrb[27].mxu0  ;;  %1533 = vmatmul.mubr.msk.f32.vlgmr.msra.gmra.mrb[24].mxu1 %vm113_vm0, %v939_v25  ;;  %v949_v28 = vadd.f32 %v1509_v7, %v1945_v43 }
 0x672   :  { %v944_v27 = vadd.f32 %v943_v26, %v1942_v41 }
 0x674   :  { %v1512_v9 = vpop.f32.mrb[28].mxu0  ;;  %1535 = vmatprep.mubr.msk.f32.mxu1 %vm113_vm0, %v944_v27 }
 0x675   :  { %v953_v10 = vpop.f32.mrb[29].mxu0  ;;  %1536 = vmatmul.mubr.msk.f32.gmra.mrb[26].mxu1 %vm113_vm0, %v949_v28  ;;  %v959_v35 = vadd.f32 %v1512_v9, %v1953_v51 }
 0x676   :  { %v954_v34 = vadd.f32 %v953_v10, %v1950_v49 }
 0x678   :  { %v1515_v11 = vpop.f32.mrb[30].mxu0  ;;  %1538 = vmatprep.mubr.msk.f32.mxu1 %vm113_vm0, %v954_v34 }
 0x679   :  { %v963_v12 = vpop.f32.mrb[31].mxu0  ;;  %1539 = vmatmul.mubr.msk.f32.gmra.mrb[28].mxu1 %vm113_vm0, %v959_v35  ;;  %v969_v43 = vadd.f32 %v1515_v11, %v1961_v59 }
 0x67a   :  { %v964_v41 = vadd.f32 %v963_v12, %v1958_v57 }
 0x67c   :  { %1541 = vmatprep.mubr.msk.f32.mxu1 %vm113_vm0, %v964_v41 }
 0x67d   :  { %1542 = vmatmul.mubr.msk.f32.gmra.mrb[30].mxu1 %vm113_vm0, %v969_v43 }
 0x744   :  { %v1534_v13 = vpop.f32.mrb[24].mxu1 }
 0x745   :  { %1102 = vst.msk [vmem:[#allocation10 + $0x8] sm:$0xff] %vm113_vm0, %v1534_v13  ;;  %v1062_v49 = vpop.f32.mrb[25].mxu1 }
 0x746   :  { %1101 = vst.msk [vmem:[#allocation10] sm:$0xff] %vm113_vm0, %v1062_v49 }
 0x748   :  { %v1537_v51 = vpop.f32.mrb[26].mxu1 }
 0x749   :  { %1104 = vst.msk [vmem:[#allocation10 + $0x18] sm:$0xff] %vm113_vm0, %v1537_v51  ;;  %v1072_v14 = vpop.f32.mrb[27].mxu1 }
 0x74a   :  { %1103 = vst.msk [vmem:[#allocation10 + $0x10] sm:$0xff] %vm113_vm0, %v1072_v14 }
 0x74c   :  { %v1540_v15 = vpop.f32.mrb[28].mxu1 }
 0x74d   :  { %1106 = vst.msk [vmem:[#allocation10 + $0x28] sm:$0xff] %vm113_vm0, %v1540_v15  ;;  %v1082_v57 = vpop.f32.mrb[29].mxu1 }
 0x74e   :  { %1105 = vst.msk [vmem:[#allocation10 + $0x20] sm:$0xff] %vm113_vm0, %v1082_v57 }
 0x750   :  { %v1543_v59 = vpop.f32.mrb[30].mxu1 }
 0x751   :  { %1108 = vst.msk [vmem:[#allocation10 + $0x38] sm:$0xff] %vm113_vm0, %v1543_v59  ;;  %v1092_v16 = vpop.f32.mrb[31].mxu1 }
 0x752   :  { %1107 = vst.msk [vmem:[#allocation10 + $0x30] sm:$0xff] %vm113_vm0, %v1092_v16 }
 0x753   :  { %1778 = shalt.err (!%p1775_p8)
}
 0x754   :  { %s1779_s15 = scalar_lea.hbm %s2090_s4, 1024 }
 0x755   :  { %p1780_p9 = scmp.ne.s32.totalorder %s2090_s4, %s1779_s15  ;;  %p1783_p10 = scmp.lt.u32.totalorder %s1779_s15, %s2090_s4 }
 0x757   :  { %p1785_p11 = pnand %p1783_p10, %p1780_p9 }
 0x759   :  { %1788 = shalt.err (!%p1785_p11)
}
 0x75a   :  { %1120 = dma.vmem_to_hbm [thread:$0]  %s1115_s12, 1024, %s2090_s4, [#allocation4], %s1799_s27, %s1799_s27, %s1800_s28  }
 0x75b   :  { %1795 = dma.done.wait [#allocation4], 1024  }
 0x75c   :  { %1796 = vsyncadd [#allocation4], 4294966272 }
 0x75d   :  { %1124 = vsyncpa [#allocation3], 1 }
 0x75e   :  { %1125 = vsyncpa [#allocation6], 1 }
 0x75f   :  { %1126 = vsyncpa [#allocation9], 1 }
 0x760   :  { %1127 = vsyncpa [#allocation4], 1 }

</bundles_post_ra>
